<compile_context>
chip_gen: v7x
topology: tpu7x:2x2x1
jax: 0.10.0
libtpu: 0.0.40
codegen_flags: <defaults>
</compile_context>

<pallas_src>
import functools

import jax
import jax.numpy as jnp
from jax.experimental import pallas as pl
from jax.experimental.pallas import tpu as pltpu


def _round_up(x, m):
    return (x + m - 1) // m * m


# --------------------------------------------------------------------------
# Pallas kernels
# --------------------------------------------------------------------------

def _mm_bias_kernel(a_ref, b_ref, t_ref, o_ref, *, relu):
    """out = act(a @ b + shift); a/b bf16, f32 accumulation + f32 epilogue."""
    y = jnp.dot(a_ref[...], b_ref[...], preferred_element_type=jnp.float32)
    y = y + t_ref[...]
    if relu:
        y = jnp.maximum(y, 0.0)
    o_ref[...] = y.astype(o_ref.dtype)


def _mm_bias_res_kernel(a_ref, b_ref, t_ref, r_ref, o_ref, *, relu):
    """Same as above plus residual (skip connection) added before the ReLU."""
    y = jnp.dot(a_ref[...], b_ref[...], preferred_element_type=jnp.float32)
    y = y + t_ref[...] + r_ref[...]
    if relu:
        y = jnp.maximum(y, 0.0)
    o_ref[...] = y.astype(o_ref.dtype)


def _maxpool_kernel(x_ref, o_ref, *, oh, ow):
    """3x3 / stride-2 max-pool over one batch element (input -inf padded)."""
    r = None
    for dh in range(3):
        for dw in range(3):
            v = x_ref[:, pl.ds(dh, oh, stride=2), pl.ds(dw, ow, stride=2), :]
            r = v if r is None else jnp.maximum(r, v)
    o_ref[...] = r


def _head_kernel(x_ref, w_ref, b_ref, o_ref):
    """Fused global-average-pool (over H*W) + final Linear(512, latent_dim)."""
    pooled = jnp.mean(x_ref[...], axis=1)                      # (N, C)
    y = jnp.dot(pooled, w_ref[...], preferred_element_type=jnp.float32)
    o_ref[...] = y + b_ref[...]


# --------------------------------------------------------------------------
# Pallas wrappers
# --------------------------------------------------------------------------

def matmul_bias_act(a, b, shift, residual=None, relu=True):
    """act(a @ b + shift (+ residual)); M/N tiled grid, bf16 dot, f32 epilogue."""
    m, k = a.shape
    _, n = b.shape

    a = a.astype(jnp.bfloat16)
    b = b.astype(jnp.bfloat16)

    kp = _round_up(k, 128)                       # aligned contraction dim
    np_ = _round_up(n, 128)                      # output-channel padding
    tn = 256 if (np_ % 256 == 0 and np_ >= 256) else 128
    tm = min(256, _round_up(m, 16))              # adaptive -> mp==m usually
    mp = _round_up(m, tm)

    if (mp, kp) != (m, k):
        a = jnp.pad(a, ((0, mp - m), (0, kp - k)))
    if (kp, np_) != (k, n):
        b = jnp.pad(b, ((0, kp - k), (0, np_ - n)))
    t = shift.reshape(1, -1).astype(jnp.float32)
    if np_ != n:
        t = jnp.pad(t, ((0, 0), (0, np_ - n)))

    grid = (mp // tm, np_ // tn)
    in_specs = [
        pl.BlockSpec((tm, kp), lambda i, j: (i, 0)),   # A: reused across j
        pl.BlockSpec((kp, tn), lambda i, j: (0, j)),   # W (BN scale folded in)
        pl.BlockSpec((1, tn), lambda i, j: (0, j)),    # shift
    ]
    args = [a, b, t]

    if residual is None:
        kernel = functools.partial(_mm_bias_kernel, relu=relu)
        res_bytes = 0
    else:
        r = residual.astype(jnp.float32)
        if (mp, np_) != (m, n):
            r = jnp.pad(r, ((0, mp - m), (0, np_ - n)))
        in_specs.append(pl.BlockSpec((tm, tn), lambda i, j: (i, j)))
        args.append(r)
        kernel = functools.partial(_mm_bias_res_kernel, relu=relu)
        res_bytes = mp * np_ * 4

    bytes_accessed = (mp * kp * 2                      # A (read once per i)
                      + (mp // tm) * kp * np_ * 2      # W (re-read per i)
                      + mp * np_ * 4                   # output
                      + res_bytes)
    cost = pl.CostEstimate(flops=2 * mp * np_ * kp,
                           transcendentals=0,
                           bytes_accessed=bytes_accessed)

    out = pl.pallas_call(
        kernel,
        out_shape=jax.ShapeDtypeStruct((mp, np_), jnp.float32),
        grid=grid,
        in_specs=in_specs,
        out_specs=pl.BlockSpec((tm, tn), lambda i, j: (i, j)),
        compiler_params=pltpu.CompilerParams(
            dimension_semantics=("parallel", "parallel"),
            vmem_limit_bytes=32 * 1024 * 1024),
        cost_estimate=cost,
    )(*args)

    if (mp, np_) == (m, n):
        return out
    return out[:m, :n]


def maxpool_3x3_s2(x):
    n, h, w, c = x.shape
    oh = (h + 2 - 3) // 2 + 1
    ow = (w + 2 - 3) // 2 + 1
    xp = jnp.pad(x, ((0, 0), (1, 1), (1, 1), (0, 0)),
                 constant_values=-jnp.inf)
    return pl.pallas_call(
        functools.partial(_maxpool_kernel, oh=oh, ow=ow),
        out_shape=jax.ShapeDtypeStruct((n, oh, ow, c), x.dtype),
        grid=(n,),
        in_specs=[pl.BlockSpec((1, h + 2, w + 2, c), lambda i: (i, 0, 0, 0))],
        out_specs=pl.BlockSpec((1, oh, ow, c), lambda i: (i, 0, 0, 0)),
        compiler_params=pltpu.CompilerParams(dimension_semantics=("parallel",)),
    )(xp)


def avgpool_fc(x, w, b):
    """x: (N, H*W, C) NHWC-flattened features; returns (N, latent_dim)."""
    n, hw, c = x.shape
    l = w.shape[1]
    np_ = _round_up(n, 8)                 # fill sublanes
    lp = _round_up(l, 128)
    x_p = jnp.pad(x, ((0, np_ - n), (0, 0), (0, 0))) if np_ != n else x
    w_p = jnp.pad(w, ((0, 0), (0, lp - l)))
    b_p = jnp.pad(b.reshape(1, -1), ((0, 0), (0, lp - l)))
    out = pl.pallas_call(
        _head_kernel,
        out_shape=jax.ShapeDtypeStruct((np_, lp), jnp.float32),
        grid=(1,),
        in_specs=[pl.BlockSpec((np_, hw, c), lambda i: (0, 0, 0)),
                  pl.BlockSpec((c, lp), lambda i: (0, 0)),
                  pl.BlockSpec((1, lp), lambda i: (0, 0))],
        out_specs=pl.BlockSpec((np_, lp), lambda i: (0, 0)),
    )(x_p, w_p, b_p)
    return out[:n, :l]


# --------------------------------------------------------------------------
# ResNet-18 glue (plain JAX: im2col patch extraction, reshapes, param setup)
# --------------------------------------------------------------------------

def _im2col(x, kh, kw, stride, pad):
    """x: NHWC -> patches (N*OH*OW, kh*kw*C), ordering (kh, kw, C)."""
    n, h, w, c = x.shape
    if pad:
        x = jnp.pad(x, ((0, 0), (pad, pad), (pad, pad), (0, 0)))
    oh = (h + 2 * pad - kh) // stride + 1
    ow = (w + 2 * pad - kw) // stride + 1
    cols = []
    for i in range(kh):
        for j in range(kw):
            cols.append(x[:, i:i + stride * (oh - 1) + 1:stride,
                          j:j + stride * (ow - 1) + 1:stride, :])
    patches = jnp.concatenate(cols, axis=-1)            # (N, OH, OW, kh*kw*C)
    return patches.reshape(n * oh * ow, kh * kw * c), oh, ow


def conv_bn(x, w, bn, stride, pad, relu=True, residual=None):
    """Conv2d (PyTorch layout OC,IC,KH,KW) + folded BN (+res) (+ReLU)."""
    n = x.shape[0]
    oc, ic, kh, kw = w.shape
    scale, shift = bn
    # im2col patches materialized directly in bf16 (halves HBM traffic).
    cols, oh, ow = _im2col(x.astype(jnp.bfloat16), kh, kw, stride, pad)
    # Fold BN scale into the weight matrix (done once, on tiny constants).
    wmat = jnp.transpose(w, (2, 3, 1, 0)).reshape(kh * kw * ic, oc)
    wmat = (wmat * scale[None, :]).astype(jnp.bfloat16)
    res = None if residual is None else residual.reshape(n * oh * ow, oc)
    out = matmul_bias_act(cols, wmat, shift, residual=res, relu=relu)
    return out.reshape(n, oh, ow, oc)


def basic_block(x, blk):
    identity = x
    out = conv_bn(x, blk['conv1'], blk['bn1'], stride=blk['stride'], pad=1,
                  relu=True)
    if 'down_conv' in blk:
        identity = conv_bn(x, blk['down_conv'], blk['down_bn'],
                           stride=blk['stride'], pad=0, relu=False)
    # conv2 + bn2 + residual-add + ReLU, all fused in one Pallas kernel call
    out = conv_bn(out, blk['conv2'], blk['bn2'], stride=1, pad=1,
                  relu=True, residual=identity)
    return out


def pretrained_conv_forward(x_nchw, params):
    # layout: x_nchw is (N, C, H, W) like the PyTorch module; kernels use NHWC.
    x = jnp.transpose(x_nchw, (0, 2, 3, 1)).astype(jnp.float32)
    x = conv_bn(x, params['stem_conv'], params['stem_bn'],
                stride=2, pad=3, relu=True)
    x = maxpool_3x3_s2(x)
    for blocks in params['layers']:
        for blk in blocks:
            x = basic_block(x, blk)
    n, h, w, c = x.shape
    return avgpool_fc(x.reshape(n, h * w, c), params['fc_w'], params['fc_b'])


# --------------------------------------------------------------------------
# Deterministic parameter construction (synthetic "pretrained" weights)
# --------------------------------------------------------------------------

def _conv_init(key, oc, ic, kh, kw):
    fan_in = ic * kh * kw
    return jax.random.normal(key, (oc, ic, kh, kw), jnp.float32) * (2.0 / fan_in) ** 0.5


def _bn_init(key, c):
    k1, k2, k3, k4 = jax.random.split(key, 4)
    gamma = 1.0 + 0.1 * jax.random.normal(k1, (c,), jnp.float32)
    beta = 0.1 * jax.random.normal(k2, (c,), jnp.float32)
    mean = 0.1 * jax.random.normal(k3, (c,), jnp.float32)
    var = 1.0 + 0.5 * jnp.abs(jax.random.normal(k4, (c,), jnp.float32))
    return gamma, beta, mean, var


def _fold_bn(gamma, beta, mean, var, eps=1e-5):
    scale = gamma / jnp.sqrt(var + eps)
    shift = beta - mean * scale
    return scale, shift


def make_resnet18_params(key, latent_dim):
    keys = iter(jax.random.split(key, 64))
    nk = lambda: next(keys)
    params = {
        'stem_conv': _conv_init(nk(), 64, 3, 7, 7),
        'stem_bn': _fold_bn(*_bn_init(nk(), 64)),
    }
    cfg = [(64, 64, 1), (64, 128, 2), (128, 256, 2), (256, 512, 2)]
    layers = []
    for in_c, out_c, stride in cfg:
        blocks = []
        for b in range(2):
            s = stride if b == 0 else 1
            ic = in_c if b == 0 else out_c
            blk = {
                'stride': s,
                'conv1': _conv_init(nk(), out_c, ic, 3, 3),
                'bn1': _fold_bn(*_bn_init(nk(), out_c)),
                'conv2': _conv_init(nk(), out_c, out_c, 3, 3),
                'bn2': _fold_bn(*_bn_init(nk(), out_c)),
            }
            if s != 1 or ic != out_c:
                blk['down_conv'] = _conv_init(nk(), out_c, ic, 1, 1)
                blk['down_bn'] = _fold_bn(*_bn_init(nk(), out_c))
            blocks.append(blk)
        layers.append(blocks)
    params['layers'] = layers
    kw_, kb_ = jax.random.split(nk())
    params['fc_w'] = jax.random.normal(kw_, (512, latent_dim), jnp.float32) * 0.02
    params['fc_b'] = jax.random.normal(kb_, (latent_dim,), jnp.float32) * 0.02
    return params


# --------------------------------------------------------------------------

if __name__ == "__main__":
    latent_dim = 32
    key = jax.random.PRNGKey(0)
    k_params, k_x = jax.random.split(key)

    params = make_resnet18_params(k_params, latent_dim)
    x = jax.random.normal(k_x, (2, 3, 32, 32), jnp.float32)   # NCHW like PyTorch

    out = pretrained_conv_forward(x, params)
    out = jax.block_until_ready(out)

    assert out.shape == (2, latent_dim), out.shape
    assert bool(jnp.all(jnp.isfinite(out)))
    print("KERNEL_OK")
</pallas_src>

<mosaic_0001>
module attributes {stable_mosaic.version = 11 : i64} {
  func.func @_mm_bias_kernel(%arg0: i32, %arg1: i32, %arg2: memref<256x256xbf16, #tpu.memory_space<vmem>>, %arg3: memref<256x128xbf16, #tpu.memory_space<vmem>>, %arg4: memref<1x128xf32, #tpu.memory_space<vmem>>, %arg5: memref<256x128xf32, #tpu.memory_space<vmem>>) attributes {dimension_semantics = [#tpu.dimension_semantics<parallel>, #tpu.dimension_semantics<parallel>], iteration_bounds = array<i64: 2, 1>, scalar_prefetch = 0 : i64, scratch_operands = 0 : i64, tpu.core_type = #tpu.core_type<tc>, window_params = [{transform_indices = @transform_0, window_bounds = array<i64: 256, 256>}, {transform_indices = @transform_1, window_bounds = array<i64: 256, 128>}, {transform_indices = @transform_2, window_bounds = array<i64: 1, 128>}, {transform_indices = @transform_3, window_bounds = array<i64: 256, 128>}]} {
    %c0 = arith.constant 0 : index
    %c0_0 = arith.constant 0 : index
    %0 = vector.load %arg2[%c0, %c0_0] : memref<256x256xbf16, #tpu.memory_space<vmem>>, vector<256x256xbf16>
    %c0_1 = arith.constant 0 : index
    %c0_2 = arith.constant 0 : index
    %1 = vector.load %arg3[%c0_1, %c0_2] : memref<256x128xbf16, #tpu.memory_space<vmem>>, vector<256x128xbf16>
    %cst = arith.constant dense<0.000000e+00> : vector<256x128xf32>
    %2 = tpu.matmul %0, %1, %cst {dimension_numbers = #tpu.dot_dimension_numbers<[1], [0], [0], [1], [0, 0, 1, 1], [], []>} : vector<256x256xbf16>, vector<256x128xbf16>, vector<256x128xf32> -> vector<256x128xf32>
    %c0_3 = arith.constant 0 : index
    %c0_4 = arith.constant 0 : index
    %3 = vector.load %arg4[%c0_3, %c0_4] : memref<1x128xf32, #tpu.memory_space<vmem>>, vector<1x128xf32>
    %4 = vector.broadcast %3 : vector<1x128xf32> to vector<256x128xf32>
    %5 = arith.addf %2, %4 : vector<256x128xf32>
    %cst_5 = arith.constant 0.000000e+00 : f32
    %6 = vector.broadcast %cst_5 : f32 to vector<256x128xf32>
    %7 = arith.maximumf %5, %6 : vector<256x128xf32>
    %c0_6 = arith.constant 0 : index
    %c0_7 = arith.constant 0 : index
    %8 = vector.load %arg5[%c0_6, %c0_7] : memref<256x128xf32, #tpu.memory_space<vmem>>, vector<256x128xf32>
    tpu.vector_store %arg5[%c0_6, %c0_7], %7 {strides = array<i32>} : memref<256x128xf32, #tpu.memory_space<vmem>>, vector<256x128xf32>,
    return
  }
  func.func @transform_0(%arg0: i32, %arg1: i32) -> (i32, i32) {
    %c0_i32 = arith.constant 0 : i32
    %c0_i32_0 = arith.constant 0 : i32
    return %arg0, %c0_i32 : i32, i32
  }
  func.func @transform_1(%arg0: i32, %arg1: i32) -> (i32, i32) {
    %c0_i32 = arith.constant 0 : i32
    %c0_i32_0 = arith.constant 0 : i32
    return %c0_i32, %arg1 : i32, i32
  }
  func.func @transform_2(%arg0: i32, %arg1: i32) -> (i32, i32) {
    %c0_i32 = arith.constant 0 : i32
    %c0_i32_0 = arith.constant 0 : i32
    return %c0_i32, %arg1 : i32, i32
  }
  func.func @transform_3(%arg0: i32, %arg1: i32) -> (i32, i32) {
    %c0_i32 = arith.constant 0 : i32
    return %arg0, %arg1 : i32, i32
  }
}

</mosaic_0001>

<bundles_post_ra>
// kernel: tpu_custom_call.1
= control target key start
LH: loop header
LB: loop body
LE: loop exit
PB: predicated region body
PF: predicated region fallthrough
CT: control target
= control target key end

     0   :  { %8 = vsyncpa [#allocation3], 0  ;;  %s1763_s0 = inlined_call_operand.hbm [shape: bf16[512,256], index: 0, kind: input, shape index: {}]   ;;  %s1764_s1 = inlined_call_operand.hbm [shape: bf16[256,128], index: 1, kind: input, shape index: {}]   ;;  %s1765_s2 = inlined_call_operand.vmem [shape: f32[1,128], index: 2, kind: input, shape index: {}]   ;;  %s1766_s3 = inlined_call_operand.hbm [shape: f32[512,128], index: 3, kind: output, shape index: {}]  }
   0x1   :  { %10 = vsyncpa [#allocation3 + $0x1], 0 }
   0x2   :  { %11 = vsyncpa [#allocation6], 0 }
   0x3   :  { %12 = vsyncpa [#allocation4], 0 }
   0x4   :  { %14 = vsyncpa [#allocation4 + $0x1], 0  ;;  %s1434_s12 = smov 0   ;;  %s1436_s13 = smov 0  }
   0x5   :  { %s1438_s14 = smov 0   ;;  %s1440_s15 = smov 0  }
   0x6   :  { %s1442_s16 = smov 0   ;;  %s1444_s17 = smov 0  }
   0x7 LB: > { %s917_s18 = sadd.s32 4294967295, %s1403_s17   ;;  %s918_s19 = sadd.s32 4294967294, %s1403_s17   ;;  %s1403_s17 = sphi %s1444_s17, %s20_s17   ;;  %s1399_s16 = sphi %s1442_s16, %s1790_s16   ;;  %s1395_s15 = sphi %s1440_s15, %s1789_s15   ;;  %s1391_s14 = sphi %s1438_s14, %s1788_s14   ;;  %s1387_s13 = sphi %s1436_s13, %s1787_s13   ;;  %s1383_s12 = sphi %s1434_s12, %s1786_s12  }
   0x8   : > { %p52_p0 = scmp.ne.s32.totalorder %s1387_s13, %s1383_s12  ;;  %p1468_p1 = scmp.eq.s32.totalorder %s917_s18, 0 }
   0x9   : > { %p1472_p2 = scmp.eq.s32.totalorder %s917_s18, 1  ;;  %p136_p3 = scmp.eq.s32.totalorder %s918_s19, 1 }
   0xa   : > { %s1771_s20 = scalar_select %p1468_p1, 1, 0 }
   0xb   : > { %s1772_s21 = scalar_select %p1472_p2, 1, 0 }
   0xc   : > { %p1478_p4 = por %p1468_p1, %p52_p0  ;;  %p919_p5 = scmp.ge.s32.totalorder %s1403_s17, 1 }
   0xd   : > { %p1483_p6 = por %p136_p3, %p52_p0  ;;  %p143_p7 = scmp.lt.s32.totalorder %s1403_s17, 3 }
   0xe   : > { %s1773_s22 = scalar_select %p1478_p4, 1, 0 }
   0xf   : > { %s1774_s23 = scalar_select %p1483_p6, 1, 0 }
  0x10   : > { %p1488_p8 = pnand %p919_p5, %p143_p7  ;;  %s1405_s25 = smov [#allocation5]  }
  0x11   : > { %s157_s26 = sshll.u32 %s1405_s25, 4  ;;  %s32_s28 = sadd.s32 1, %s1399_s16  ;;  %s158_s26 = int_to_ptr.vmem [resolvable:$true] %s157_s26 }
  0x12   : > { %s1775_s24 = scalar_select %p1488_p8, 1, 0 }
  0x13   : > { %p1124_p9 = pneg %p1488_p8  ;;  %s1259_s4 = scalar_lea.hbm %s1764_s1, 2048 }
  0x14   : > { %p1260_p12 = scmp.ne.s32.totalorder %s1764_s1, %s1259_s4  ;;  %p1266_p5 = scmp.lt.u32.totalorder %s1259_s4, %s1764_s1 }
  0x15   : > { %p1497_p11 = pnand %p1124_p9, %p1468_p1 }
  0x17   : > { %p1261_p13 = pneg %p1497_p11 }
  0x19   : > { %p1262_p0 = pnand %p1261_p13, %p1260_p12 }
  0x1b   : > { %p1263_p3 = pneg %p1262_p0 }
  0x1d   : > { %p1268_p7 = pnand %p1266_p5, %p1263_p3 }
  0x1f   : > { %1271 = shalt.err (!%p1268_p7)
}
  0x20   : > { %s1272_s9 = scalar_lea.vmem %s158_s26, 2048  ;;  %p1280_p1 = scmp.lt.s32.totalorder %s158_s26, %s158_s26 }
  0x21   : > { %p1273_p9 = scmp.ne.s32.totalorder %s158_s26, %s1272_s9  ;;  %p1281_p4 = scmp.lt.s32.totalorder %s1272_s9, %s1272_s9 }
  0x23   : > { %p1275_p10 = pnand %p1273_p9, %p1261_p13  ;;  %p1282_p8 = por %p1281_p4, %p1280_p1 }
  0x25   : > { %p1276_p6 = pneg %p1275_p10 }
  0x27   : > { %p1283_p2 = pnand %p1282_p8, %p1276_p6 }
  0x29   : > { %1286 = shalt.err (!%p1283_p2)
}
  0x2a   : > { %s1406_s10 = smov 64   ;;  %s1407_s11 = smov 4  }
  0x2b   : > { %1127 = dma.hbm_to_vmem [thread:$0]  (!%p1497_p11), %s1764_s1, 2048, %s158_s26, [#allocation6], %s1406_s10, %s1406_s10, %s1407_s11  }
  0x2c   : > { %p34_p1 = scmp.ge.s32.totalorder %s32_s28, 2  ;;  %s39_s25 = sadd.s32 1, %s1391_s14 }
  0x2d   : > { %p46_p2 = scmp.ne.s32.totalorder %s1391_s14, %s1387_s13  ;;  %p47_p4 = scmp.eq.s32.totalorder %s1403_s17, 0 }
  0x2e   : > { %s1792_s28 = smov (%p34_p1, %s32_s28), 0  ;;  %p1778_p8 = scmp.ne.s32.totalorder %s1772_s21, 0 }
  0x2f   : > { %p1524_p6 = por %p47_p4, %p46_p2  ;;  %s36_s27 = ssub.s32 %s1399_s16, %s1792_s28 }
  0x30   : > { %p1530_p10 = por %p1778_p8, %p46_p2  ;;  %p1137_p12 = scmp.lt.s32.totalorder %s1403_s17, 2 }
  0x31   : > { %p37_p11 = scmp.eq.s32.totalorder %s36_s27, 0  ;;  %s177_s26 = sand.u32 1, %s1391_s14  }
  0x32   : > { %s923_s4 = sshll.u32 %s177_s26, 8  ;;  %s986_s6 = sshll.u32 %s1399_s16, 12 }
  0x33   : > { %s1539_s5 = scalar_select %p37_p11, %s1391_s14, %s39_s25  }
  0x34   : > { %s1545_s9 = scalar_lea.hbm %s1763_s0, %s986_s6  ;;  %s181_s21 = scalar_lea.vmem [#allocation2], %s923_s4 }
  0x35   : > { %s189_s10 = sshll.u32 %s181_s21, 4  ;;  %p1551_p13 = pnand %p1137_p12, %p1524_p6  ;;  %s1547_s10 = int_to_ptr.vmem [resolvable:$true] %s189_s10 }
  0x36   : > { %s1555_s18 = scalar_lea.sflag [#allocation3], %s177_s26  ;;  %s1287_s19 = scalar_lea.hbm %s1545_s9, 4096 }
  0x37   : > { %p1288_p0 = scmp.ne.s32.totalorder %s1545_s9, %s1287_s19  ;;  %p1289_p3 = pneg %p1551_p13 }
  0x38   : > { %s1292_s29 = scalar_lea.hbm %s1763_s0, 8192  ;;  %p1293_p9 = scmp.lt.u32.totalorder %s1545_s9, %s1763_s0 }
  0x39   : > { %p1290_p5 = pnand %p1289_p3, %p1288_p0  ;;  %p1294_p1 = scmp.lt.u32.totalorder %s1292_s29, %s1287_s19 }
  0x3a   : > { %p1296_p4 = scmp.lt.u32.totalorder %s1287_s19, %s1545_s9 }
  0x3b   : > { %p1291_p7 = pneg %p1290_p5  ;;  %p1295_p2 = por %p1294_p1, %p1293_p9 }
  0x3d   : > { %p1297_p6 = por %p1296_p4, %p1295_p2 }
  0x3f   : > { %p1298_p8 = pnand %p1297_p6, %p1291_p7 }
  0x41   : > { %1301 = shalt.err (!%p1298_p8)
}
  0x42   : > { %s1302_s26 = scalar_lea.vmem %s1547_s10, 4096  ;;  %s1408_s7 = smov [#allocation2]  }
  0x43   : > { %p1303_p12 = scmp.ne.s32.totalorder %s1547_s10, %s1302_s26  ;;  %s1307_s8 = sshll.u32 %s1408_s7, 4  ;;  %s1308_s8 = int_to_ptr.vmem [resolvable:$false] %s1307_s8 }
  0x44   : > { %s1309_s21 = scalar_lea.vmem %s1308_s8, 8192  ;;  %p1310_p5 = scmp.lt.s32.totalorder %s1547_s10, %s1308_s8 }
  0x45   : > { %p1305_p11 = pnand %p1303_p12, %p1289_p3  ;;  %p1311_p9 = scmp.lt.s32.totalorder %s1309_s21, %s1302_s26 }
  0x47   : > { %p1306_p0 = pneg %p1305_p11  ;;  %p1312_p1 = por %p1311_p9, %p1310_p5 }
  0x49   : > { %p1313_p2 = pnand %p1312_p1, %p1306_p0 }
  0x4b   : > { %1316 = shalt.err (!%p1313_p2)
}
  0x4c   : > { %s1409_s19 = smov 128   ;;  %s1410_s25 = smov 8  }
  0x4d   : > { %1131 = dma.hbm_to_vmem [thread:$0]  (!%p1551_p13), %s1545_s9, 4096, %s1547_s10, %s1555_s18, %s1409_s19, %s1409_s19, %s1410_s25  }
  0x4e   : > { %p1781_p3 = scmp.ne.s32.totalorder %s1775_s24, 0 }
  0x4f   : > { %s1586_s27 = sand.u32 (!%p1781_p3), 1, %s1387_s13   ;;  %p1782_p7 = scmp.ne.s32.totalorder (!%p1781_p3), %s1773_s22, 0 }
  0x50   : > { %201 = sbr.rel (%p1781_p3) target bundleno = 416 (0x1a0), region = 32  ;;  %s928_s29 = sshll.u32 (!%p1781_p3), %s1586_s27, 8 }
  0x51   : > { %s204_s4 = scalar_lea.sflag (!%p1781_p3), [#allocation3], %s1586_s27  ;;  %s1592_s6 = scalar_lea.vmem (!%p1781_p3), [#allocation2], %s928_s29 }
  0x57   : > { %1370 = dma.done.wait (%p1782_p7), %s204_s4, 4096  }
  0x58   : > { %1372 = vsyncadd (%p1782_p7), %s204_s4, 4294963200  ;;  %p1783_p13 = scmp.ne.s32.totalorder %s1771_s20, 0 }
  0x5a   : > { %1374 = dma.done.wait (%p1783_p13), [#allocation6], 2048  }
  0x5b   : > { %1376 = vsyncadd (%p1783_p13), [#allocation6], 4294965248  ;;  %v1195_v0 = vld [vmem:[#allocation5 + $0x40] sm:$0xff]   ;;  %v1197_v2 = vld [vmem:[#allocation5 + $0x48] sm:$0xff]   ;;  %s1645_s24 = scalar_lea.vmem [#allocation7], %s928_s29  ;;  %s987_s9 = sshll.u32 %s1395_s15, 12 }
  0x5c   : > { %v1196_v1 = vld [vmem:[#allocation5] sm:$0xff]   ;;  %988 = vmatprep.subr.bf16.mxu0 %v1195_v0  ;;  %1100 = vmatprep.subr.bf16.mxu1 %v1195_v0  ;;  %v1198_v3 = vld [vmem:[#allocation5 + $0x8] sm:$0xff]   ;;  %v1199_v4 = vld [vmem:[#allocation5 + $0x50] sm:$0xff]   ;;  %s810_s10 = sshll.u32 %s1645_s24, 4  ;;  %s1708_s26 = scalar_lea.hbm %s1766_s3, %s987_s9  ;;  %s1710_s10 = int_to_ptr.vmem [resolvable:$true] %s810_s10 }
  0x5d   : > { %989 = vmatpush3.bf16.msra.mxu0 %v1196_v1  ;;  %1108 = vmatpush3.bf16.msra.mxu1 %v1196_v1  ;;  %v1200_v5 = vld [vmem:[#allocation5 + $0x10] sm:$0xff]   ;;  %v1201_v6 = vld [vmem:[#allocation5 + $0x58] sm:$0xff]   ;;  %v1203_v8 = vld [vmem:[#allocation5 + $0x60] sm:$0xff]   ;;  %s796_s15 = scalar_lea.sflag [#allocation4], %s1586_s27  ;;  %s1317_s7 = scalar_lea.vmem %s1710_s10, 4096 }
  0x5e   : > { %990 = vmatprep.subr.bf16.mxu0 %v1197_v2  ;;  %1101 = vmatprep.subr.bf16.mxu1 %v1197_v2  ;;  %v1202_v7 = vld [vmem:[#allocation5 + $0x18] sm:$0xff]   ;;  %v1204_v9 = vld [vmem:[#allocation5 + $0x20] sm:$0xff]   ;;  %v1205_v10 = vld [vmem:[#allocation5 + $0x68] sm:$0xff]   ;;  %p1318_p4 = scmp.ne.s32.totalorder %s1710_s10, %s1317_s7  ;;  %s1411_s8 = smov [#allocation7]  }
  0x5f   : > { %v1213_v11 = vld [vmem:[%s1592_s6 + $0x4] ss:$8 sps:$4 sm:$0xff]   ;;  %v1207_v14 = vld [vmem:[#allocation5 + $0x70] sm:$0xff]   ;;  %v1209_v16 = vld [vmem:[#allocation5 + $0x78] sm:$0xff]   ;;  %s1321_s21 = sshll.u32 %s1411_s8, 4  ;;  %s1322_s21 = int_to_ptr.vmem [resolvable:$false] %s1321_s21 }
  0x60   : > { %v1216_v12 = vld [vmem:[%s1592_s6 + $0x84] ss:$8 sps:$4 sm:$0xff]   ;;  %602 = vmatprep.mubr.bf16.mxu0 %v1213_v11  ;;  %v1208_v15 = vld [vmem:[#allocation5 + $0x30] sm:$0xff]   ;;  %v1210_v17 = vld [vmem:[#allocation5 + $0x38] sm:$0xff]   ;;  %p1319_p6 = pnand %p1318_p4, %p1530_p10  ;;  %s1323_s19 = scalar_lea.vmem %s1322_s21, 8192 }
  0x61   : > { %991 = vmatpush3.bf16.msra.mxu0 %v1198_v3  ;;  %1109 = vmatpush3.bf16.msra.mxu1 %v1198_v3  ;;  %v1206_v13 = vld [vmem:[#allocation5 + $0x28] sm:$0xff]   ;;  %v1217_v20 = vld [vmem:[%s1592_s6 + $0x14] ss:$8 sps:$4 sm:$0xff]   ;;  %v1221_v22 = vld [vmem:[%s1592_s6 + $0x10] ss:$8 sps:$4 sm:$0xff]   ;;  %p1324_p12 = scmp.lt.s32.totalorder %s1710_s10, %s1322_s21  ;;  %p1325_p11 = scmp.lt.s32.totalorder %s1323_s19, %s1317_s7 }
  0x62   : > { %992 = vmatprep.subr.bf16.mxu0 %v1199_v4  ;;  %1102 = vmatprep.subr.bf16.mxu1 %v1199_v4  ;;  %v1211_v18 = vld [vmem:[%s1592_s6] ss:$8 sps:$4 sm:$0xff]   ;;  %v1219_v21 = vld [vmem:[%s1592_s6 + $0x94] ss:$8 sps:$4 sm:$0xff]   ;;  %v1222_v23 = vld [vmem:[%s1592_s6 + $0x90] ss:$8 sps:$4 sm:$0xff]   ;;  %p1320_p8 = pneg %p1319_p6 }
  0x63   : > { %666 = vmatprep.mubr.bf16.mxu1 %v1216_v12  ;;  %v1214_v19 = vld [vmem:[%s1592_s6 + $0x80] ss:$8 sps:$4 sm:$0xff]   ;;  %v1223_v24 = vld [vmem:[%s1592_s6 + $0x24] ss:$8 sps:$4 sm:$0xff]   ;;  %v1229_v28 = vld [vmem:[%s1592_s6 + $0x34] ss:$8 sps:$4 sm:$0xff]   ;;  %p1326_p0 = por %p1325_p11, %p1324_p12 }
  0x64   : > { %v1225_v25 = vld [vmem:[%s1592_s6 + $0xa4] ss:$8 sps:$4 sm:$0xff]   ;;  %v1227_v26 = vld [vmem:[%s1592_s6 + $0x20] ss:$8 sps:$4 sm:$0xff]   ;;  %v1231_v29 = vld [vmem:[%s1592_s6 + $0xb4] ss:$8 sps:$4 sm:$0xff]  }
  0x65   : > { %993 = vmatpush3.bf16.msra.mxu0 %v1200_v5  ;;  %1110 = vmatpush3.bf16.msra.mxu1 %v1200_v5  ;;  %v1228_v27 = vld [vmem:[%s1592_s6 + $0xa0] ss:$8 sps:$4 sm:$0xff]   ;;  %v1233_v30 = vld [vmem:[%s1592_s6 + $0x30] ss:$8 sps:$4 sm:$0xff]   ;;  %v1235_v32 = vld [vmem:[%s1592_s6 + $0x44] ss:$8 sps:$4 sm:$0xff]   ;;  %p1327_p5 = pnand %p1326_p0, %p1320_p8 }
  0x66   : > { %994 = vmatprep.subr.bf16.mxu0 %v1201_v6  ;;  %1103 = vmatprep.subr.bf16.mxu1 %v1201_v6  ;;  %v1234_v31 = vld [vmem:[%s1592_s6 + $0xb0] ss:$8 sps:$4 sm:$0xff]   ;;  %v1237_v33 = vld [vmem:[%s1592_s6 + $0xc4] ss:$8 sps:$4 sm:$0xff]   ;;  %v1239_v34 = vld [vmem:[%s1592_s6 + $0x40] ss:$8 sps:$4 sm:$0xff]  }
  0x67   : > { %v1240_v35 = vld [vmem:[%s1592_s6 + $0xc0] ss:$8 sps:$4 sm:$0xff]   ;;  %v1241_v36 = vld [vmem:[%s1592_s6 + $0x54] ss:$8 sps:$4 sm:$0xff]   ;;  %v1245_v38 = vld [vmem:[%s1592_s6 + $0x50] ss:$8 sps:$4 sm:$0xff]  }
  0x68   : > { %v1243_v37 = vld [vmem:[%s1592_s6 + $0xd4] ss:$8 sps:$4 sm:$0xff]   ;;  %v1246_v39 = vld [vmem:[%s1592_s6 + $0xd0] ss:$8 sps:$4 sm:$0xff]   ;;  %v1247_v40 = vld [vmem:[%s1592_s6 + $0x64] ss:$8 sps:$4 sm:$0xff]  }
  0x69   : > { %995 = vmatpush3.bf16.msra.mxu0 %v1202_v7  ;;  %1111 = vmatpush3.bf16.msra.mxu1 %v1202_v7  ;;  %v1249_v41 = vld [vmem:[%s1592_s6 + $0xe4] ss:$8 sps:$4 sm:$0xff]   ;;  %v1251_v42 = vld [vmem:[%s1592_s6 + $0x60] ss:$8 sps:$4 sm:$0xff]   ;;  %v1253_v44 = vld [vmem:[%s1592_s6 + $0x74] ss:$8 sps:$4 sm:$0xff]  }
  0x6a   : > { %996 = vmatprep.subr.bf16.mxu0 %v1203_v8  ;;  %1104 = vmatprep.subr.bf16.mxu1 %v1203_v8  ;;  %v1252_v43 = vld [vmem:[%s1592_s6 + $0xe0] ss:$8 sps:$4 sm:$0xff]   ;;  %v1255_v45 = vld [vmem:[%s1592_s6 + $0xf4] ss:$8 sps:$4 sm:$0xff]   ;;  %v1257_v46 = vld [vmem:[%s1592_s6 + $0x70] ss:$8 sps:$4 sm:$0xff]  }
  0x6b   : > { %v1258_v47 = vld [vmem:[%s1592_s6 + $0xf0] ss:$8 sps:$4 sm:$0xff]   ;;  %v1637_v50 = vld [vmem:[%s1765_s2] ss:$0 sm:$0xff] }
  0x6d   : > { %997 = vmatpush3.bf16.msra.mxu0 %v1204_v9  ;;  %1112 = vmatpush3.bf16.msra.mxu1 %v1204_v9 }
  0x6e   : > { %998 = vmatprep.subr.bf16.mxu0 %v1205_v10  ;;  %1105 = vmatprep.subr.bf16.mxu1 %v1205_v10 }
  0x71   : > { %999 = vmatpush3.bf16.msra.mxu0 %v1206_v13  ;;  %1113 = vmatpush3.bf16.msra.mxu1 %v1206_v13 }
  0x72   : > { %1000 = vmatprep.subr.bf16.mxu0 %v1207_v14  ;;  %1106 = vmatprep.subr.bf16.mxu1 %v1207_v14 }
  0x75   : > { %1001 = vmatpush3.bf16.msra.mxu0 %v1208_v15  ;;  %1114 = vmatpush3.bf16.msra.mxu1 %v1208_v15 }
  0x76   : > { %1002 = vmatprep.subr.bf16.mxu0 %v1209_v16  ;;  %1107 = vmatprep.subr.bf16.mxu1 %v1209_v16 }
  0x79   : > { %1003 = vmatpush3.bf16.msra.mxu0 %v1210_v17  ;;  %1115 = vmatpush3.bf16.msra.mxu1 %v1210_v17 }
  0x7c   : > { %603 = vmatmul.mubr.bf16.vlgmr.msra.gmra.mrb[0].mxu0 %v1211_v18  ;;  %667 = vmatmul.mubr.bf16.vlgmr.msra.gmra.mrb[0].mxu1 %v1214_v19 }
  0x7d   : > { %610 = vmatprep.mubr.bf16.mxu0 %v1217_v20  ;;  %674 = vmatprep.mubr.bf16.mxu1 %v1219_v21 }
  0x84   : > { %611 = vmatmul.mubr.bf16.gmra.mrb[4].mxu0 %v1221_v22  ;;  %675 = vmatmul.mubr.bf16.gmra.mrb[4].mxu1 %v1222_v23 }
  0x85   : > { %618 = vmatprep.mubr.bf16.mxu0 %v1223_v24  ;;  %682 = vmatprep.mubr.bf16.mxu1 %v1225_v25 }
  0x8c   : > { %619 = vmatmul.mubr.bf16.gmra.mrb[8].mxu0 %v1227_v26  ;;  %683 = vmatmul.mubr.bf16.gmra.mrb[8].mxu1 %v1228_v27 }
  0x8d   : > { %626 = vmatprep.mubr.bf16.mxu0 %v1229_v28  ;;  %690 = vmatprep.mubr.bf16.mxu1 %v1231_v29 }
  0x94   : > { %627 = vmatmul.mubr.bf16.gmra.mrb[12].mxu0 %v1233_v30  ;;  %691 = vmatmul.mubr.bf16.gmra.mrb[12].mxu1 %v1234_v31 }
  0x95   : > { %634 = vmatprep.mubr.bf16.mxu0 %v1235_v32  ;;  %698 = vmatprep.mubr.bf16.mxu1 %v1237_v33 }
  0x9c   : > { %635 = vmatmul.mubr.bf16.gmra.mrb[16].mxu0 %v1239_v34  ;;  %699 = vmatmul.mubr.bf16.gmra.mrb[16].mxu1 %v1240_v35 }
  0x9d   : > { %642 = vmatprep.mubr.bf16.mxu0 %v1241_v36  ;;  %706 = vmatprep.mubr.bf16.mxu1 %v1243_v37 }
  0xa4   : > { %643 = vmatmul.mubr.bf16.gmra.mrb[20].mxu0 %v1245_v38  ;;  %707 = vmatmul.mubr.bf16.gmra.mrb[20].mxu1 %v1246_v39 }
  0xa5   : > { %650 = vmatprep.mubr.bf16.mxu0 %v1247_v40  ;;  %714 = vmatprep.mubr.bf16.mxu1 %v1249_v41 }
  0xac   : > { %651 = vmatmul.mubr.bf16.gmra.mrb[24].mxu0 %v1251_v42  ;;  %715 = vmatmul.mubr.bf16.gmra.mrb[24].mxu1 %v1252_v43 }
  0xad   : > { %658 = vmatprep.mubr.bf16.mxu0 %v1253_v44  ;;  %722 = vmatprep.mubr.bf16.mxu1 %v1255_v45 }
  0xb4   : > { %659 = vmatmul.mubr.bf16.gmra.mrb[28].mxu0 %v1257_v46  ;;  %723 = vmatmul.mubr.bf16.gmra.mrb[28].mxu1 %v1258_v47 }
 0x14f   : > { %v1004_v48 = vpop.f32.mrb[0].mxu0  ;;  %v1052_v49 = vpop.f32.mrb[0].mxu1 }
 0x150   : > { %v1005_v51 = vpop.f32.mrb[1].mxu0  ;;  %v1053_v52 = vpop.f32.mrb[1].mxu1 }
 0x151   : > { %v1006_v53 = vadd.f32 %v1005_v51, %v1004_v48  ;;  %v1054_v54 = vadd.f32 %v1053_v52, %v1052_v49  ;;  %v1007_v55 = vpop.f32.mrb[2].mxu0  ;;  %v1055_v56 = vpop.f32.mrb[2].mxu1 }
 0x152   : > { %v1008_v57 = vpop.f32.mrb[3].mxu0  ;;  %v1056_v58 = vpop.f32.mrb[3].mxu1 }
 0x153   : > { %v605_v59 = vadd.f32 %v1006_v53, %v1637_v50  ;;  %v669_v60 = vadd.f32 %v1054_v54, %v1637_v50  ;;  %v1009_v61 = vadd.f32 %v1008_v57, %v1007_v55  ;;  %v1057_v62 = vadd.f32 %v1056_v58, %v1055_v56 }
 0x155   : > { %v731_v63 = vmax.f32 %v605_v59, 0.0  ;;  %v747_v0 = vmax.f32 %v669_v60, 0.0  ;;  %v608_v1 = vadd.f32 %v1009_v61, %v1637_v50  ;;  %v672_v2 = vadd.f32 %v1057_v62, %v1637_v50 }
 0x157   : > { %763 = vst [vmem:[%s1645_s24] sm:$0xff] %v731_v63  ;;  %779 = vst [vmem:[%s1645_s24 + $0x80] sm:$0xff] %v747_v0  ;;  %v732_v3 = vmax.f32 %v608_v1, 0.0  ;;  %v748_v4 = vmax.f32 %v672_v2, 0.0  ;;  %v1010_v5 = vpop.f32.mrb[4].mxu0  ;;  %v1058_v6 = vpop.f32.mrb[4].mxu1 }
 0x158   : > { %v1011_v7 = vpop.f32.mrb[5].mxu0  ;;  %v1059_v8 = vpop.f32.mrb[5].mxu1 }
 0x159   : > { %764 = vst [vmem:[%s1645_s24 + $0x8] sm:$0xff] %v732_v3  ;;  %780 = vst [vmem:[%s1645_s24 + $0x88] sm:$0xff] %v748_v4  ;;  %v1012_v9 = vadd.f32 %v1011_v7, %v1010_v5  ;;  %v1060_v10 = vadd.f32 %v1059_v8, %v1058_v6  ;;  %v1013_v11 = vpop.f32.mrb[6].mxu0  ;;  %v1061_v12 = vpop.f32.mrb[6].mxu1 }
 0x15a   : > { %v1014_v13 = vpop.f32.mrb[7].mxu0  ;;  %v1062_v14 = vpop.f32.mrb[7].mxu1 }
 0x15b   : > { %v613_v15 = vadd.f32 %v1012_v9, %v1637_v50  ;;  %v677_v16 = vadd.f32 %v1060_v10, %v1637_v50  ;;  %v1015_v17 = vadd.f32 %v1014_v13, %v1013_v11  ;;  %v1063_v18 = vadd.f32 %v1062_v14, %v1061_v12 }
 0x15d   : > { %v733_v19 = vmax.f32 %v613_v15, 0.0  ;;  %v749_v20 = vmax.f32 %v677_v16, 0.0  ;;  %v616_v21 = vadd.f32 %v1015_v17, %v1637_v50  ;;  %v680_v22 = vadd.f32 %v1063_v18, %v1637_v50 }
 0x15f   : > { %765 = vst [vmem:[%s1645_s24 + $0x10] sm:$0xff] %v733_v19  ;;  %781 = vst [vmem:[%s1645_s24 + $0x90] sm:$0xff] %v749_v20  ;;  %v734_v23 = vmax.f32 %v616_v21, 0.0  ;;  %v750_v24 = vmax.f32 %v680_v22, 0.0  ;;  %v1016_v25 = vpop.f32.mrb[8].mxu0  ;;  %v1064_v26 = vpop.f32.mrb[8].mxu1 }
 0x160   : > { %v1017_v27 = vpop.f32.mrb[9].mxu0  ;;  %v1065_v28 = vpop.f32.mrb[9].mxu1 }
 0x161   : > { %766 = vst [vmem:[%s1645_s24 + $0x18] sm:$0xff] %v734_v23  ;;  %782 = vst [vmem:[%s1645_s24 + $0x98] sm:$0xff] %v750_v24  ;;  %v1018_v29 = vadd.f32 %v1017_v27, %v1016_v25  ;;  %v1066_v30 = vadd.f32 %v1065_v28, %v1064_v26  ;;  %v1019_v31 = vpop.f32.mrb[10].mxu0  ;;  %v1067_v32 = vpop.f32.mrb[10].mxu1 }
 0x162   : > { %v1020_v33 = vpop.f32.mrb[11].mxu0  ;;  %v1068_v34 = vpop.f32.mrb[11].mxu1 }
 0x163   : > { %v621_v35 = vadd.f32 %v1018_v29, %v1637_v50  ;;  %v685_v36 = vadd.f32 %v1066_v30, %v1637_v50  ;;  %v1021_v37 = vadd.f32 %v1020_v33, %v1019_v31  ;;  %v1069_v38 = vadd.f32 %v1068_v34, %v1067_v32 }
 0x165   : > { %v735_v39 = vmax.f32 %v621_v35, 0.0  ;;  %v751_v40 = vmax.f32 %v685_v36, 0.0  ;;  %v624_v41 = vadd.f32 %v1021_v37, %v1637_v50  ;;  %v688_v42 = vadd.f32 %v1069_v38, %v1637_v50 }
 0x167   : > { %767 = vst [vmem:[%s1645_s24 + $0x20] sm:$0xff] %v735_v39  ;;  %783 = vst [vmem:[%s1645_s24 + $0xa0] sm:$0xff] %v751_v40  ;;  %v736_v43 = vmax.f32 %v624_v41, 0.0  ;;  %v752_v44 = vmax.f32 %v688_v42, 0.0  ;;  %v1022_v45 = vpop.f32.mrb[12].mxu0  ;;  %v1070_v46 = vpop.f32.mrb[12].mxu1 }
 0x168   : > { %v1023_v47 = vpop.f32.mrb[13].mxu0  ;;  %v1071_v48 = vpop.f32.mrb[13].mxu1 }
 0x169   : > { %768 = vst [vmem:[%s1645_s24 + $0x28] sm:$0xff] %v736_v43  ;;  %784 = vst [vmem:[%s1645_s24 + $0xa8] sm:$0xff] %v752_v44  ;;  %v1024_v49 = vadd.f32 %v1023_v47, %v1022_v45  ;;  %v1072_v51 = vadd.f32 %v1071_v48, %v1070_v46  ;;  %v1025_v52 = vpop.f32.mrb[14].mxu0  ;;  %v1073_v53 = vpop.f32.mrb[14].mxu1 }
 0x16a   : > { %v1026_v54 = vpop.f32.mrb[15].mxu0  ;;  %v1074_v55 = vpop.f32.mrb[15].mxu1 }
 0x16b   : > { %v629_v56 = vadd.f32 %v1024_v49, %v1637_v50  ;;  %v693_v57 = vadd.f32 %v1072_v51, %v1637_v50  ;;  %v1027_v58 = vadd.f32 %v1026_v54, %v1025_v52  ;;  %v1075_v59 = vadd.f32 %v1074_v55, %v1073_v53 }
 0x16d   : > { %v737_v60 = vmax.f32 %v629_v56, 0.0  ;;  %v753_v61 = vmax.f32 %v693_v57, 0.0  ;;  %v632_v62 = vadd.f32 %v1027_v58, %v1637_v50  ;;  %v696_v63 = vadd.f32 %v1075_v59, %v1637_v50 }
 0x16f   : > { %769 = vst [vmem:[%s1645_s24 + $0x30] sm:$0xff] %v737_v60  ;;  %785 = vst [vmem:[%s1645_s24 + $0xb0] sm:$0xff] %v753_v61  ;;  %v738_v0 = vmax.f32 %v632_v62, 0.0  ;;  %v754_v1 = vmax.f32 %v696_v63, 0.0  ;;  %v1028_v2 = vpop.f32.mrb[16].mxu0  ;;  %v1076_v3 = vpop.f32.mrb[16].mxu1 }
 0x170   : > { %v1029_v4 = vpop.f32.mrb[17].mxu0  ;;  %v1077_v5 = vpop.f32.mrb[17].mxu1 }
 0x171   : > { %770 = vst [vmem:[%s1645_s24 + $0x38] sm:$0xff] %v738_v0  ;;  %786 = vst [vmem:[%s1645_s24 + $0xb8] sm:$0xff] %v754_v1  ;;  %v1030_v6 = vadd.f32 %v1029_v4, %v1028_v2  ;;  %v1078_v7 = vadd.f32 %v1077_v5, %v1076_v3  ;;  %v1031_v8 = vpop.f32.mrb[18].mxu0  ;;  %v1079_v9 = vpop.f32.mrb[18].mxu1 }
 0x172   : > { %v1032_v10 = vpop.f32.mrb[19].mxu0  ;;  %v1080_v11 = vpop.f32.mrb[19].mxu1 }
 0x173   : > { %v637_v12 = vadd.f32 %v1030_v6, %v1637_v50  ;;  %v701_v13 = vadd.f32 %v1078_v7, %v1637_v50  ;;  %v1033_v14 = vadd.f32 %v1032_v10, %v1031_v8  ;;  %v1081_v15 = vadd.f32 %v1080_v11, %v1079_v9 }
 0x175   : > { %v739_v16 = vmax.f32 %v637_v12, 0.0  ;;  %v755_v17 = vmax.f32 %v701_v13, 0.0  ;;  %v640_v18 = vadd.f32 %v1033_v14, %v1637_v50  ;;  %v704_v19 = vadd.f32 %v1081_v15, %v1637_v50 }
 0x177   : > { %771 = vst [vmem:[%s1645_s24 + $0x40] sm:$0xff] %v739_v16  ;;  %787 = vst [vmem:[%s1645_s24 + $0xc0] sm:$0xff] %v755_v17  ;;  %v740_v20 = vmax.f32 %v640_v18, 0.0  ;;  %v756_v21 = vmax.f32 %v704_v19, 0.0  ;;  %v1034_v22 = vpop.f32.mrb[20].mxu0  ;;  %v1082_v23 = vpop.f32.mrb[20].mxu1 }
 0x178   : > { %v1035_v24 = vpop.f32.mrb[21].mxu0  ;;  %v1083_v25 = vpop.f32.mrb[21].mxu1 }
 0x179   : > { %772 = vst [vmem:[%s1645_s24 + $0x48] sm:$0xff] %v740_v20  ;;  %788 = vst [vmem:[%s1645_s24 + $0xc8] sm:$0xff] %v756_v21  ;;  %v1036_v26 = vadd.f32 %v1035_v24, %v1034_v22  ;;  %v1084_v27 = vadd.f32 %v1083_v25, %v1082_v23  ;;  %v1037_v28 = vpop.f32.mrb[22].mxu0  ;;  %v1085_v29 = vpop.f32.mrb[22].mxu1 }
 0x17a   : > { %v1038_v30 = vpop.f32.mrb[23].mxu0  ;;  %v1086_v31 = vpop.f32.mrb[23].mxu1 }
 0x17b   : > { %v645_v32 = vadd.f32 %v1036_v26, %v1637_v50  ;;  %v709_v33 = vadd.f32 %v1084_v27, %v1637_v50  ;;  %v1039_v34 = vadd.f32 %v1038_v30, %v1037_v28  ;;  %v1087_v35 = vadd.f32 %v1086_v31, %v1085_v29 }
 0x17d   : > { %v741_v36 = vmax.f32 %v645_v32, 0.0  ;;  %v757_v37 = vmax.f32 %v709_v33, 0.0  ;;  %v648_v38 = vadd.f32 %v1039_v34, %v1637_v50  ;;  %v712_v39 = vadd.f32 %v1087_v35, %v1637_v50 }
 0x17f   : > { %773 = vst [vmem:[%s1645_s24 + $0x50] sm:$0xff] %v741_v36  ;;  %789 = vst [vmem:[%s1645_s24 + $0xd0] sm:$0xff] %v757_v37  ;;  %v742_v40 = vmax.f32 %v648_v38, 0.0  ;;  %v758_v41 = vmax.f32 %v712_v39, 0.0  ;;  %v1040_v42 = vpop.f32.mrb[24].mxu0  ;;  %v1088_v43 = vpop.f32.mrb[24].mxu1 }
 0x180   : > { %v1041_v44 = vpop.f32.mrb[25].mxu0  ;;  %v1089_v45 = vpop.f32.mrb[25].mxu1 }
 0x181   : > { %774 = vst [vmem:[%s1645_s24 + $0x58] sm:$0xff] %v742_v40  ;;  %790 = vst [vmem:[%s1645_s24 + $0xd8] sm:$0xff] %v758_v41  ;;  %v1042_v46 = vadd.f32 %v1041_v44, %v1040_v42  ;;  %v1090_v47 = vadd.f32 %v1089_v45, %v1088_v43  ;;  %v1043_v48 = vpop.f32.mrb[26].mxu0  ;;  %v1091_v49 = vpop.f32.mrb[26].mxu1 }
 0x182   : > { %v1044_v51 = vpop.f32.mrb[27].mxu0  ;;  %v1092_v52 = vpop.f32.mrb[27].mxu1 }
 0x183   : > { %v653_v53 = vadd.f32 %v1042_v46, %v1637_v50  ;;  %v717_v54 = vadd.f32 %v1090_v47, %v1637_v50  ;;  %v1045_v55 = vadd.f32 %v1044_v51, %v1043_v48  ;;  %v1093_v56 = vadd.f32 %v1092_v52, %v1091_v49 }
 0x185   : > { %v743_v57 = vmax.f32 %v653_v53, 0.0  ;;  %v759_v58 = vmax.f32 %v717_v54, 0.0  ;;  %v656_v59 = vadd.f32 %v1045_v55, %v1637_v50  ;;  %v720_v60 = vadd.f32 %v1093_v56, %v1637_v50 }
 0x187   : > { %775 = vst [vmem:[%s1645_s24 + $0x60] sm:$0xff] %v743_v57  ;;  %791 = vst [vmem:[%s1645_s24 + $0xe0] sm:$0xff] %v759_v58  ;;  %v744_v61 = vmax.f32 %v656_v59, 0.0  ;;  %v760_v62 = vmax.f32 %v720_v60, 0.0  ;;  %v1046_v63 = vpop.f32.mrb[28].mxu0  ;;  %v1094_v0 = vpop.f32.mrb[28].mxu1 }
 0x188   : > { %v1047_v1 = vpop.f32.mrb[29].mxu0  ;;  %v1095_v2 = vpop.f32.mrb[29].mxu1 }
 0x189   : > { %776 = vst [vmem:[%s1645_s24 + $0x68] sm:$0xff] %v744_v61  ;;  %792 = vst [vmem:[%s1645_s24 + $0xe8] sm:$0xff] %v760_v62  ;;  %v1048_v3 = vadd.f32 %v1047_v1, %v1046_v63  ;;  %v1096_v4 = vadd.f32 %v1095_v2, %v1094_v0  ;;  %v1049_v5 = vpop.f32.mrb[30].mxu0  ;;  %v1097_v6 = vpop.f32.mrb[30].mxu1 }
 0x18a   : > { %v1050_v7 = vpop.f32.mrb[31].mxu0  ;;  %v1098_v8 = vpop.f32.mrb[31].mxu1 }
 0x18b   : > { %v661_v9 = vadd.f32 %v1048_v3, %v1637_v50  ;;  %v725_v10 = vadd.f32 %v1096_v4, %v1637_v50  ;;  %v1051_v11 = vadd.f32 %v1050_v7, %v1049_v5  ;;  %v1099_v12 = vadd.f32 %v1098_v8, %v1097_v6 }
 0x18d   : > { %v745_v13 = vmax.f32 %v661_v9, 0.0  ;;  %v761_v14 = vmax.f32 %v725_v10, 0.0  ;;  %v664_v15 = vadd.f32 %v1051_v11, %v1637_v50  ;;  %v728_v16 = vadd.f32 %v1099_v12, %v1637_v50 }
 0x18f   : > { %777 = vst [vmem:[%s1645_s24 + $0x70] sm:$0xff] %v745_v13  ;;  %793 = vst [vmem:[%s1645_s24 + $0xf0] sm:$0xff] %v761_v14  ;;  %v746_v17 = vmax.f32 %v664_v15, 0.0  ;;  %v762_v18 = vmax.f32 %v728_v16, 0.0 }
 0x191   : > { %778 = vst [vmem:[%s1645_s24 + $0x78] sm:$0xff] %v746_v17  ;;  %794 = vst [vmem:[%s1645_s24 + $0xf8] sm:$0xff] %v762_v18 }
 0x192   : > { %1330 = shalt.err (!%p1327_p5)
}
 0x193   : > { %s1331_s25 = scalar_lea.hbm %s1708_s26, 4096  ;;  %s1335_s6 = scalar_lea.hbm %s1766_s3, 8192 }
 0x194   : > { %p1332_p9 = scmp.ne.s32.totalorder %s1708_s26, %s1331_s25  ;;  %p1336_p3 = scmp.lt.u32.totalorder %s1708_s26, %s1766_s3 }
 0x195   : > { %p1337_p7 = scmp.lt.u32.totalorder %s1335_s6, %s1331_s25  ;;  %p1339_p4 = scmp.lt.u32.totalorder %s1331_s25, %s1708_s26 }
 0x196   : > { %p1333_p1 = pnand %p1332_p9, %p1530_p10 }
 0x197   : > { %p1338_p13 = por %p1337_p7, %p1336_p3 }
 0x198   : > { %p1334_p2 = pneg %p1333_p1 }
 0x199   : > { %p1340_p6 = por %p1339_p4, %p1338_p13 }
 0x19b   : > { %p1341_p8 = pnand %p1340_p6, %p1334_p2 }
 0x19d   : > { %1344 = shalt.err (!%p1341_p8)
}
 0x19e   : > { %s1412_s24 = smov 128   ;;  %s1413_s9 = smov 8  }
 0x19f   : > { %1122 = dma.vmem_to_hbm [thread:$0]  (%p1530_p10), %s1710_s10, 4096, %s1708_s26, %s796_s15, %s1412_s24, %s1412_s24, %s1413_s9  }
 0x1a0 PF: > { %s825_s11 = sand.u32 1, %s1383_s12   ;;  %p1784_p12 = scmp.ne.s32.totalorder %s1774_s23, 0 }
 0x1a1   : > { %p1785_p11 = scmp.ge.s32.totalorder %s1403_s17, 2  ;;  %s826_s18 = scalar_lea.sflag [#allocation4], %s825_s11 }
 0x1a3   : > { %p1133_p0 = pnand %p1785_p11, %p1784_p12 }
 0x1a5   : > { %1378 = dma.done.wait (!%p1133_p0), %s826_s18, 4096  }
 0x1a6   : > { %1380 = vsyncadd (!%p1133_p0), %s826_s18, 4294963200  ;;  %s20_s17 = sadd.s32 1, %s1403_s17   ;;  %s1786_s12 = smov %s1387_s13 }
 0x1a7   : > { %p17_p5 = scmp.ge.s32.totalorder %s20_s17, 4   ;;  %s1787_s13 = smov %s1391_s14 }
 0x1a8   : > { %s1788_s14 = smov %s1539_s5  ;;  %s1789_s15 = smov %s1399_s16 }
 0x1a9   : > { %s1790_s16 = smov %s1792_s28  ;;  %19 = sbr.rel (!%p17_p5) target bundleno = 7 (0x7), region = 85 }
 0x1b0   :  { %831 = vsyncpa [#allocation3], 1 }
 0x1b1   :  { %833 = vsyncpa [#allocation3 + $0x1], 1 }
 0x1b2   :  { %834 = vsyncpa [#allocation6], 1 }
 0x1b3   :  { %835 = vsyncpa [#allocation4], 1 }
 0x1b4   :  { %837 = vsyncpa [#allocation4 + $0x1], 1 }

</bundles_post_ra>
